<compile_context>
chip_gen: v5e
topology: v5e:2x2
jax: 0.10.0
libtpu: 0.0.40
codegen_flags: <defaults>
</compile_context>

<pallas_src>
import functools

import jax
import jax.numpy as jnp
from jax.experimental import pallas as pl
from jax.experimental.pallas import tpu as pltpu


def _dropout_kernel(seed_ref, x_ref, o_ref, *, threshold, scale):
    block_rows, width = x_ref.shape

    # Global element index of every lane in this tile.
    row0 = pl.program_id(0) * block_rows
    rows_iota = jax.lax.broadcasted_iota(jnp.int32, (block_rows, width), 0)
    cols_iota = jax.lax.broadcasted_iota(jnp.int32, (block_rows, width), 1)
    idx = (row0 + rows_iota) * width + cols_iota

    # Stateless counter-based PRNG: murmur3 fmix32 over (seed, element index).
    # All integer VPU ops; independent per element -> grid axis is parallel.
    seed_mix = seed_ref[0].astype(jnp.uint32) * jnp.uint32(0x9E3779B9)
    h = idx.astype(jnp.uint32) + seed_mix
    h = h ^ (h >> 16)
    h = h * jnp.uint32(0x85EBCA6B)
    h = h ^ (h >> 13)
    h = h * jnp.uint32(0xC2B2AE35)
    h = h ^ (h >> 16)

    # Top 24 bits as a non-negative int32; uniform u ~= r24 / 2^24.
    # torch semantics: keep where uniform(0,1) > fraction.
    r24 = (h >> 8).astype(jnp.int32)
    keep = r24 > threshold

    x = x_ref[...]
    o_ref[...] = jnp.where(keep, x * scale, 0).astype(o_ref.dtype)


def _choose_tiling(total, itemsize):
    """Pick a lane-dense (rows, width) flattening and a ~2 MiB row block."""
    width = None
    for cand in (4096, 2048, 1024, 512, 256, 128):
        if total % cand == 0:
            width = cand
            break
    assert width is not None, "dropout kernel assumes size divisible by 128"
    rows = total // width

    # Sublane packing: 8 for f32, 16 for bf16, 32 for int8/fp8.
    packing = max(8, 32 // itemsize)
    # ~2 MiB blocks: safe under v5e's 16 MiB scoped-VMEM default with
    # double-buffered in + out, and already ~85%+ of HBM roofline.
    target_rows = max(packing, (2 * 1024 * 1024) // (width * itemsize))

    if rows <= target_rows:
        block_rows = rows  # full row extent (allowed even if < 8)
    else:
        block_rows = packing
        r = (target_rows // packing) * packing
        while r >= packing:
            if rows % r == 0:
                block_rows = r
                break
            r -= packing
        if rows % block_rows != 0:
            block_rows = rows  # fallback: single block
    return rows, width, block_rows


def dropout(x, seed, *, fraction=0.1, training=True):
    """Pallas implementation of the PyTorch Dropout module's forward."""
    if not training:
        return x

    orig_shape = x.shape
    total = x.size
    itemsize = jnp.dtype(x.dtype).itemsize
    rows, width, block_rows = _choose_tiling(total, itemsize)

    flat = x.reshape(rows, width)
    grid = (rows // block_rows,)

    seed_arr = jnp.asarray([seed], dtype=jnp.int32)
    threshold = int(fraction * (1 << 24))   # keep iff top-24-bit draw > threshold
    scale = 1.0 / (1.0 - fraction)

    kernel = functools.partial(_dropout_kernel, threshold=threshold, scale=scale)

    out = pl.pallas_call(
        kernel,
        out_shape=jax.ShapeDtypeStruct((rows, width), x.dtype),
        grid_spec=pltpu.PrefetchScalarGridSpec(
            num_scalar_prefetch=1,
            grid=grid,
            in_specs=[pl.BlockSpec((block_rows, width), lambda i, seed_ref: (i, 0))],
            out_specs=pl.BlockSpec((block_rows, width), lambda i, seed_ref: (i, 0)),
        ),
        compiler_params=pltpu.CompilerParams(
            # Stateless per-element hash -> tiles are independent; lets v7x
            # shard the grid across its two TensorCores.
            dimension_semantics=("parallel",),
        ),
    )(seed_arr, flat)

    return out.reshape(orig_shape)


if __name__ == "__main__":
    key = jax.random.PRNGKey(0)
    x = jax.random.normal(key, (2, 4, 16, 16), dtype=jnp.float32)  # NCHW
    fraction = 0.1

    y = jax.block_until_ready(dropout(x, seed=42, fraction=fraction, training=True))

    # Sanity checks: same shape/dtype; surviving elements are exactly x / (1-p).
    assert y.shape == x.shape and y.dtype == x.dtype
    kept = y != 0
    scaled = x / (1.0 - fraction)
    assert bool(jnp.allclose(jnp.where(kept, y, 0.0),
                             jnp.where(kept, scaled, 0.0), rtol=1e-6, atol=1e-6))
    keep_rate = float(jnp.mean(kept.astype(jnp.float32)))
    assert 0.75 < keep_rate < 1.0  # expected ~0.9

    # Eval mode is identity.
    y_eval = jax.block_until_ready(dropout(x, seed=42, fraction=fraction, training=False))
    assert bool(jnp.array_equal(y_eval, x))

    print("KERNEL_OK")
</pallas_src>

<mosaic_0001>
module attributes {stable_mosaic.version = 11 : i64} {
  func.func @_dropout_kernel(%arg0: i32, %arg1: memref<1xi32, #tpu.memory_space<smem>>, %arg2: memref<1x2048xf32, #tpu.memory_space<vmem>>, %arg3: memref<1x2048xf32, #tpu.memory_space<vmem>>) attributes {dimension_semantics = [#tpu.dimension_semantics<parallel>], iteration_bounds = array<i64: 1>, scalar_prefetch = 1 : i64, scratch_operands = 0 : i64, tpu.core_type = #tpu.core_type<tc>, window_params = [{transform_indices = @transform_0, window_bounds = array<i64: 1, 2048>}, {transform_indices = @transform_1, window_bounds = array<i64: 1, 2048>}]} {
    %c1_i32 = arith.constant 1 : i32
    %0 = arith.muli %arg0, %c1_i32 : i32
    %1 = tpu.iota {dimensions = array<i32: 0>} : vector<1x2048xi32>
    %2 = tpu.iota {dimensions = array<i32: 1>} : vector<1x2048xi32>
    %3 = vector.broadcast %0 : i32 to vector<1x2048xi32>
    %4 = arith.addi %3, %1 : vector<1x2048xi32>
    %c2048_i32 = arith.constant 2048 : i32
    %5 = vector.broadcast %c2048_i32 : i32 to vector<1x2048xi32>
    %6 = arith.muli %4, %5 : vector<1x2048xi32>
    %7 = arith.addi %6, %2 : vector<1x2048xi32>
    %c0 = arith.constant 0 : index
    %8 = memref.load %arg1[%c0] : memref<1xi32, #tpu.memory_space<smem>>
    %c-1640531527_i32 = arith.constant -1640531527 : i32
    %9 = arith.muli %8, %c-1640531527_i32 : i32
    %10 = vector.broadcast %9 : i32 to vector<1x2048xi32>
    %11 = arith.addi %7, %10 : vector<1x2048xi32>
    %c16_i32 = arith.constant 16 : i32
    %12 = vector.broadcast %c16_i32 : i32 to vector<1x2048xi32>
    %13 = arith.shrui %11, %12 : vector<1x2048xi32>
    %14 = arith.xori %11, %13 : vector<1x2048xi32>
    %c-2048144789_i32 = arith.constant -2048144789 : i32
    %15 = vector.broadcast %c-2048144789_i32 : i32 to vector<1x2048xi32>
    %16 = arith.muli %14, %15 : vector<1x2048xi32>
    %c13_i32 = arith.constant 13 : i32
    %17 = vector.broadcast %c13_i32 : i32 to vector<1x2048xi32>
    %18 = arith.shrui %16, %17 : vector<1x2048xi32>
    %19 = arith.xori %16, %18 : vector<1x2048xi32>
    %c-1028477387_i32 = arith.constant -1028477387 : i32
    %20 = vector.broadcast %c-1028477387_i32 : i32 to vector<1x2048xi32>
    %21 = arith.muli %19, %20 : vector<1x2048xi32>
    %c16_i32_0 = arith.constant 16 : i32
    %22 = vector.broadcast %c16_i32_0 : i32 to vector<1x2048xi32>
    %23 = arith.shrui %21, %22 : vector<1x2048xi32>
    %24 = arith.xori %21, %23 : vector<1x2048xi32>
    %c8_i32 = arith.constant 8 : i32
    %25 = vector.broadcast %c8_i32 : i32 to vector<1x2048xi32>
    %26 = arith.shrui %24, %25 : vector<1x2048xi32>
    %c1677721_i32 = arith.constant 1677721 : i32
    %27 = vector.broadcast %c1677721_i32 : i32 to vector<1x2048xi32>
    %28 = arith.cmpi sgt, %26, %27 : vector<1x2048xi32>
    %c0_1 = arith.constant 0 : index
    %c0_2 = arith.constant 0 : index
    %29 = vector.load %arg2[%c0_1, %c0_2] : memref<1x2048xf32, #tpu.memory_space<vmem>>, vector<1x2048xf32>
    %cst = arith.constant 1.11111116 : f32
    %30 = vector.broadcast %cst : f32 to vector<1x2048xf32>
    %31 = arith.mulf %29, %30 : vector<1x2048xf32>
    %c0_i32 = arith.constant 0 : i32
    %32 = arith.sitofp %c0_i32 : i32 to f32
    %33 = vector.broadcast %32 : f32 to vector<1x2048xf32>
    %34 = arith.select %28, %31, %33 : vector<1x2048xi1>, vector<1x2048xf32>
    %c0_3 = arith.constant 0 : index
    %c0_4 = arith.constant 0 : index
    %35 = vector.load %arg3[%c0_3, %c0_4] : memref<1x2048xf32, #tpu.memory_space<vmem>>, vector<1x2048xf32>
    tpu.vector_store %arg3[%c0_3, %c0_4], %34 {strides = array<i32>} : memref<1x2048xf32, #tpu.memory_space<vmem>>, vector<1x2048xf32>,
    return
  }
  func.func @transform_0(%arg0: i32, %arg1: memref<1xi32, #tpu.memory_space<smem>>) -> (i32, i32) {
    %c0_i32 = arith.constant 0 : i32
    %c0_i32_0 = arith.constant 0 : i32
    return %arg0, %c0_i32 : i32, i32
  }
  func.func @transform_1(%arg0: i32, %arg1: memref<1xi32, #tpu.memory_space<smem>>) -> (i32, i32) {
    %c0_i32 = arith.constant 0 : i32
    %c0_i32_0 = arith.constant 0 : i32
    return %arg0, %c0_i32 : i32, i32
  }
}

</mosaic_0001>

<bundles_post_ra>
// kernel: tpu_custom_call.1
= control target key start
LH: loop header
LB: loop body
LE: loop exit
PB: predicated region body
PF: predicated region fallthrough
CT: control target
= control target key end

     0   :  { %8 = vsyncpa [#allocation5], 0  ;;  %s552_s0 = inlined_call_operand.<no memory space> [shape: s32[1], index: 0, kind: input, shape index: {}]   ;;  %s553_s1 = inlined_call_operand.hbm [shape: f32[1,2048], index: 1, kind: input, shape index: {}]   ;;  %s554_s2 = inlined_call_operand.hbm [shape: f32[1,2048], index: 2, kind: output, shape index: {}]  }
   0x1   :  { %9 = vsyncpa [#allocation6], 0  ;;  %s15_s11 = sshll.u32 %s553_s1, 4  ;;  %s422_s12 = smov [#allocation4]   ;;  %s16_s11 = int_to_ptr.hbm [resolvable:$true] %s15_s11 }
   0x2   :  { %s17_s13 = sshll.u32 %s422_s12, 4  ;;  %s18_s13 = int_to_ptr.vmem [resolvable:$true] %s17_s13 }
   0x3   :  { %20 = dma.hbm_to_vmem [thread:$0]  %s16_s11, 256, %s18_s13, [#allocation5]  }
   0x4   :  { %418 = dma.done.wait [#allocation5], 256  }
   0x5   :  { %419 = vsyncadd [#allocation5], 4294967040  ;;  %v25_v0 = vlaneseq  ;;  %s64_s16 = smul.u32 2654435769, %s552_s0  ;;  %s423_s0 = smov [#allocation7]  }
   0x6   :  { %s356_s1 = sshll.u32 %s423_s0, 4  ;;  %s358_s19 = sshll.u32 %s554_s2, 4  ;;  %s357_s1 = int_to_ptr.vmem [resolvable:$true] %s356_s1  ;;  %s359_s19 = int_to_ptr.hbm [resolvable:$true] %s358_s19 }
   0x7   :  { %v28_v1 = vand.u32 127, %v25_v0  ;;  %v26_v2 = vshrl.u32 %v25_v0, 7  ;;  %v65_v6 = vstv %s64_s16 }
   0x9   :  { %v29_v3 = vadd.s32 128, %v28_v1  ;;  %v30_v4 = vadd.s32 256, %v28_v1  ;;  %v31_v5 = vadd.s32 384, %v28_v1  ;;  %v32_v7 = vadd.s32 512, %v28_v1 }
   0xa   :  { %v33_v8 = vadd.s32 640, %v28_v1  ;;  %v34_v9 = vadd.s32 768, %v28_v1  ;;  %v46_v10 = vmul.u32 2048, %v26_v2  ;;  %v35_v11 = vadd.s32 896, %v28_v1 }
   0xb   :  { %v36_v12 = vadd.s32 1024, %v28_v1  ;;  %v37_v13 = vadd.s32 1152, %v28_v1  ;;  %v38_v14 = vadd.s32 1280, %v28_v1  ;;  %v39_v15 = vadd.s32 1408, %v28_v1 }
   0xc   :  { %v40_v16 = vadd.s32 1536, %v28_v1  ;;  %v41_v17 = vadd.s32 1664, %v28_v1  ;;  %v47_v18 = vadd.s32 %v46_v10, %v28_v1  ;;  %v42_v19 = vadd.s32 1792, %v28_v1 }
   0xd   :  { %v48_v20 = vadd.s32 %v46_v10, %v29_v3  ;;  %v49_v21 = vadd.s32 %v46_v10, %v30_v4  ;;  %v50_v22 = vadd.s32 %v46_v10, %v31_v5  ;;  %v43_v23 = vadd.s32 1920, %v28_v1 }
   0xe   :  { %v51_v24 = vadd.s32 %v46_v10, %v32_v7  ;;  %v52_v25 = vadd.s32 %v46_v10, %v33_v8  ;;  %v53_v26 = vadd.s32 %v46_v10, %v34_v9  ;;  %v54_v27 = vadd.s32 %v46_v10, %v35_v11 }
   0xf   :  { %v55_v28 = vadd.s32 %v46_v10, %v36_v12  ;;  %v56_v29 = vadd.s32 %v46_v10, %v37_v13  ;;  %v57_v30 = vadd.s32 %v46_v10, %v38_v14  ;;  %v58_v31 = vadd.s32 %v46_v10, %v39_v15 }
  0x10   :  { %v59_v32 = vadd.s32 %v46_v10, %v40_v16  ;;  %v60_v33 = vadd.s32 %v46_v10, %v41_v17  ;;  %v66_v34 = vadd.s32 %v65_v6, %v47_v18  ;;  %v61_v35 = vadd.s32 %v46_v10, %v42_v19 }
  0x11   :  { %v67_v36 = vadd.s32 %v65_v6, %v48_v20  ;;  %v68_v37 = vadd.s32 %v65_v6, %v49_v21  ;;  %v69_v38 = vadd.s32 %v65_v6, %v50_v22  ;;  %v62_v39 = vadd.s32 %v46_v10, %v43_v23 }
  0x12   :  { %v70_v40 = vadd.s32 %v65_v6, %v51_v24  ;;  %v71_v41 = vadd.s32 %v65_v6, %v52_v25  ;;  %v72_v42 = vadd.s32 %v65_v6, %v53_v26  ;;  %v73_v43 = vadd.s32 %v65_v6, %v54_v27 }
  0x13   :  { %v74_v44 = vadd.s32 %v65_v6, %v55_v28  ;;  %v75_v45 = vadd.s32 %v65_v6, %v56_v29  ;;  %v76_v46 = vadd.s32 %v65_v6, %v57_v30  ;;  %v77_v47 = vadd.s32 %v65_v6, %v58_v31 }
  0x14   :  { %v78_v48 = vadd.s32 %v65_v6, %v59_v32  ;;  %v79_v49 = vadd.s32 %v65_v6, %v60_v33  ;;  %v82_v50 = vshrl.u32 %v66_v34, 16  ;;  %v80_v51 = vadd.s32 %v65_v6, %v61_v35 }
  0x15   :  { %v83_v52 = vshrl.u32 %v67_v36, 16  ;;  %v84_v53 = vshrl.u32 %v68_v37, 16  ;;  %v85_v54 = vshrl.u32 %v69_v38, 16  ;;  %v81_v55 = vadd.s32 %v65_v6, %v62_v39 }
  0x16   :  { %v86_v56 = vshrl.u32 %v70_v40, 16  ;;  %v87_v57 = vshrl.u32 %v71_v41, 16  ;;  %v88_v58 = vshrl.u32 %v72_v42, 16  ;;  %v89_v59 = vshrl.u32 %v73_v43, 16 }
  0x17   :  { %v90_v60 = vshrl.u32 %v74_v44, 16  ;;  %v91_v61 = vshrl.u32 %v75_v45, 16  ;;  %v92_v62 = vshrl.u32 %v76_v46, 16  ;;  %v93_v63 = vshrl.u32 %v77_v47, 16 }
  0x18   :  { %v94_v0 = vshrl.u32 %v78_v48, 16  ;;  %v95_v1 = vshrl.u32 %v79_v49, 16  ;;  %v98_v2 = vxor.u32 %v82_v50, %v66_v34  ;;  %v96_v3 = vshrl.u32 %v80_v51, 16 }
  0x19   :  { %v99_v4 = vxor.u32 %v83_v52, %v67_v36  ;;  %v100_v5 = vxor.u32 %v84_v53, %v68_v37  ;;  %v101_v7 = vxor.u32 %v85_v54, %v69_v38  ;;  %v97_v8 = vshrl.u32 %v81_v55, 16 }
  0x1a   :  { %v102_v9 = vxor.u32 %v86_v56, %v70_v40  ;;  %v103_v10 = vxor.u32 %v87_v57, %v71_v41  ;;  %v104_v11 = vxor.u32 %v88_v58, %v72_v42  ;;  %v105_v6 = vxor.u32 %v89_v59, %v73_v43 }
  0x1b   :  { %v106_v12 = vxor.u32 %v90_v60, %v74_v44  ;;  %v107_v13 = vxor.u32 %v91_v61, %v75_v45  ;;  %v108_v14 = vxor.u32 %v92_v62, %v76_v46  ;;  %v109_v15 = vxor.u32 %v93_v63, %v77_v47 }
  0x1c   :  { %v110_v16 = vxor.u32 %v94_v0, %v78_v48  ;;  %v111_v17 = vxor.u32 %v95_v1, %v79_v49  ;;  %v114_v18 = vmul.u32 2246822507, %v98_v2  ;;  %v112_v19 = vxor.u32 %v96_v3, %v80_v51 }
  0x1d   :  { %v115_v20 = vmul.u32 2246822507, %v99_v4  ;;  %v116_v21 = vmul.u32 2246822507, %v100_v5  ;;  %v117_v22 = vmul.u32 2246822507, %v101_v7  ;;  %v113_v23 = vxor.u32 %v97_v8, %v81_v55 }
  0x1e   :  { %v118_v24 = vmul.u32 2246822507, %v102_v9  ;;  %v119_v25 = vmul.u32 2246822507, %v103_v10  ;;  %v120_v26 = vmul.u32 2246822507, %v104_v11 }
  0x1f   :  { %v121_v27 = vmul.u32 2246822507, %v105_v6  ;;  %v122_v28 = vmul.u32 2246822507, %v106_v12  ;;  %v123_v29 = vmul.u32 2246822507, %v107_v13 }
  0x20   :  { %v124_v30 = vmul.u32 2246822507, %v108_v14  ;;  %v125_v31 = vmul.u32 2246822507, %v109_v15  ;;  %v126_v32 = vmul.u32 2246822507, %v110_v16 }
  0x21   :  { %v127_v33 = vmul.u32 2246822507, %v111_v17  ;;  %v128_v34 = vmul.u32 2246822507, %v112_v19  ;;  %v130_v35 = vshrl.u32 %v114_v18, 13  ;;  %v131_v37 = vshrl.u32 %v115_v20, 13 }
  0x22   :  { %v129_v36 = vmul.u32 2246822507, %v113_v23  ;;  %v132_v38 = vshrl.u32 %v116_v21, 13  ;;  %v133_v39 = vshrl.u32 %v117_v22, 13  ;;  %v134_v40 = vshrl.u32 %v118_v24, 13 }
  0x23   :  { %v135_v41 = vshrl.u32 %v119_v25, 13  ;;  %v136_v42 = vshrl.u32 %v120_v26, 13  ;;  %v137_v43 = vshrl.u32 %v121_v27, 13  ;;  %v138_v44 = vshrl.u32 %v122_v28, 13 }
  0x24   :  { %v139_v45 = vshrl.u32 %v123_v29, 13  ;;  %v140_v46 = vshrl.u32 %v124_v30, 13  ;;  %v141_v47 = vshrl.u32 %v125_v31, 13  ;;  %v142_v48 = vshrl.u32 %v126_v32, 13 }
  0x25   :  { %v143_v49 = vshrl.u32 %v127_v33, 13  ;;  %v144_v50 = vshrl.u32 %v128_v34, 13  ;;  %v146_v51 = vxor.u32 %v130_v35, %v114_v18  ;;  %v145_v52 = vshrl.u32 %v129_v36, 13 }
  0x26   :  { %v147_v53 = vxor.u32 %v131_v37, %v115_v20  ;;  %v148_v54 = vxor.u32 %v132_v38, %v116_v21  ;;  %v149_v55 = vxor.u32 %v133_v39, %v117_v22  ;;  %v150_v56 = vxor.u32 %v134_v40, %v118_v24 }
  0x27   :  { %v151_v57 = vxor.u32 %v135_v41, %v119_v25  ;;  %v152_v58 = vxor.u32 %v136_v42, %v120_v26  ;;  %v153_v59 = vxor.u32 %v137_v43, %v121_v27  ;;  %v154_v60 = vxor.u32 %v138_v44, %v122_v28 }
  0x28   :  { %v155_v61 = vxor.u32 %v139_v45, %v123_v29  ;;  %v156_v62 = vxor.u32 %v140_v46, %v124_v30  ;;  %v157_v63 = vxor.u32 %v141_v47, %v125_v31  ;;  %v158_v0 = vxor.u32 %v142_v48, %v126_v32 }
  0x29   :  { %v159_v1 = vxor.u32 %v143_v49, %v127_v33  ;;  %v160_v2 = vxor.u32 %v144_v50, %v128_v34  ;;  %v162_v3 = vmul.u32 3266489909, %v146_v51  ;;  %v161_v4 = vxor.u32 %v145_v52, %v129_v36 }
  0x2a   :  { %v163_v5 = vmul.u32 3266489909, %v147_v53  ;;  %v164_v7 = vmul.u32 3266489909, %v148_v54  ;;  %v165_v8 = vmul.u32 3266489909, %v149_v55 }
  0x2b   :  { %v166_v9 = vmul.u32 3266489909, %v150_v56  ;;  %v167_v10 = vmul.u32 3266489909, %v151_v57  ;;  %v168_v11 = vmul.u32 3266489909, %v152_v58 }
  0x2c   :  { %v169_v6 = vmul.u32 3266489909, %v153_v59  ;;  %v170_v12 = vmul.u32 3266489909, %v154_v60  ;;  %v171_v13 = vmul.u32 3266489909, %v155_v61 }
  0x2d   :  { %v172_v14 = vmul.u32 3266489909, %v156_v62  ;;  %v173_v15 = vmul.u32 3266489909, %v157_v63  ;;  %v174_v16 = vmul.u32 3266489909, %v158_v0 }
  0x2e   :  { %v175_v17 = vmul.u32 3266489909, %v159_v1  ;;  %v176_v18 = vmul.u32 3266489909, %v160_v2  ;;  %v177_v19 = vmul.u32 3266489909, %v161_v4 }
  0x2f   :  { %v178_v20 = vshrl.u32 %v162_v3, 16  ;;  %v179_v21 = vshrl.u32 %v163_v5, 16  ;;  %v180_v22 = vshrl.u32 %v164_v7, 16  ;;  %v181_v23 = vshrl.u32 %v165_v8, 16  ;;  %v242_v4 = vld [vmem:[#allocation4] sm:$0xff] }
  0x30   :  { %v182_v24 = vshrl.u32 %v166_v9, 16  ;;  %v183_v25 = vshrl.u32 %v167_v10, 16  ;;  %v184_v26 = vshrl.u32 %v168_v11, 16  ;;  %v185_v27 = vshrl.u32 %v169_v6, 16 }
  0x31   :  { %v186_v28 = vshrl.u32 %v170_v12, 16  ;;  %v187_v29 = vshrl.u32 %v171_v13, 16  ;;  %v188_v30 = vshrl.u32 %v172_v14, 16  ;;  %v189_v31 = vshrl.u32 %v173_v15, 16 }
  0x32   :  { %v190_v32 = vshrl.u32 %v174_v16, 16  ;;  %v191_v33 = vshrl.u32 %v175_v17, 16  ;;  %v192_v34 = vshrl.u32 %v176_v18, 16  ;;  %v193_v35 = vshrl.u32 %v177_v19, 16 }
  0x33   :  { %v194_v36 = vxor.u32 %v178_v20, %v162_v3  ;;  %v195_v37 = vxor.u32 %v179_v21, %v163_v5  ;;  %v196_v38 = vxor.u32 %v180_v22, %v164_v7  ;;  %v197_v39 = vxor.u32 %v181_v23, %v165_v8 }
  0x34   :  { %v198_v40 = vxor.u32 %v182_v24, %v166_v9  ;;  %v199_v41 = vxor.u32 %v183_v25, %v167_v10  ;;  %v200_v42 = vxor.u32 %v184_v26, %v168_v11  ;;  %v201_v43 = vxor.u32 %v185_v27, %v169_v6  ;;  %v243_v9 = vld [vmem:[#allocation4 + $0x8] sm:$0xff] }
  0x35   :  { %v202_v44 = vxor.u32 %v186_v28, %v170_v12  ;;  %v203_v45 = vxor.u32 %v187_v29, %v171_v13  ;;  %v204_v46 = vxor.u32 %v188_v30, %v172_v14  ;;  %v205_v47 = vxor.u32 %v189_v31, %v173_v15 }
  0x36   :  { %v206_v48 = vxor.u32 %v190_v32, %v174_v16  ;;  %v207_v49 = vxor.u32 %v191_v33, %v175_v17  ;;  %v208_v50 = vxor.u32 %v192_v34, %v176_v18  ;;  %v209_v51 = vxor.u32 %v193_v35, %v177_v19 }
  0x37   :  { %v210_v52 = vshrl.u32 %v194_v36, 8  ;;  %v211_v53 = vshrl.u32 %v195_v37, 8  ;;  %v212_v54 = vshrl.u32 %v196_v38, 8  ;;  %v213_v55 = vshrl.u32 %v197_v39, 8 }
  0x38   :  { %v214_v56 = vshrl.u32 %v198_v40, 8  ;;  %v215_v57 = vshrl.u32 %v199_v41, 8  ;;  %v216_v58 = vshrl.u32 %v200_v42, 8  ;;  %v217_v59 = vshrl.u32 %v201_v43, 8 }
  0x39   :  { %v218_v60 = vshrl.u32 %v202_v44, 8  ;;  %v219_v61 = vshrl.u32 %v203_v45, 8  ;;  %v220_v62 = vshrl.u32 %v204_v46, 8  ;;  %v221_v63 = vshrl.u32 %v205_v47, 8 }
  0x3a   :  { %v222_v0 = vshrl.u32 %v206_v48, 8  ;;  %v223_v1 = vshrl.u32 %v207_v49, 8  ;;  %v224_v2 = vshrl.u32 %v208_v50, 8  ;;  %v225_v3 = vshrl.u32 %v209_v51, 8 }
  0x3b   :  { %vm445_vm0 = vcmp.gt.s32.totalorder %v210_v52, 1677721  ;;  %vm449_vm1 = vcmp.gt.s32.totalorder %v211_v53, 1677721  ;;  %vm453_vm2 = vcmp.gt.s32.totalorder %v212_v54, 1677721 }
  0x3c   :  { %vm457_vm3 = vcmp.gt.s32.totalorder %v213_v55, 1677721  ;;  %vm461_vm4 = vcmp.gt.s32.totalorder %v214_v56, 1677721  ;;  %vm465_vm5 = vcmp.gt.s32.totalorder %v215_v57, 1677721 }
  0x3d   :  { %vm469_vm6 = vcmp.gt.s32.totalorder %v216_v58, 1677721  ;;  %vm473_vm7 = vcmp.gt.s32.totalorder %v217_v59, 1677721  ;;  %vm477_vm8 = vcmp.gt.s32.totalorder %v218_v60, 1677721 }
  0x3e   :  { %vm481_vm9 = vcmp.gt.s32.totalorder %v219_v61, 1677721  ;;  %vm485_vm10 = vcmp.gt.s32.totalorder %v220_v62, 1677721  ;;  %v575_v16 = vmov 0  ;;  %v577_v17 = vmov 0 }
  0x3f   :  { %v576_v16 = vsel %vm485_vm10, 4294967295, %v575_v16  ;;  %vm489_vm11 = vcmp.gt.s32.totalorder %v221_v63, 1677721  ;;  %vm493_vm12 = vcmp.gt.s32.totalorder %v222_v0, 1677721  ;;  %v579_v18 = vmov 0 }
  0x40   :  { %v578_v17 = vsel %vm489_vm11, 4294967295, %v577_v17  ;;  %v580_v18 = vsel %vm493_vm12, 4294967295, %v579_v18  ;;  %vm497_vm13 = vcmp.gt.s32.totalorder %v223_v1, 1677721  ;;  %v581_v19 = vmov 0 }
  0x41   :  { %v582_v19 = vsel %vm497_vm13, 4294967295, %v581_v19  ;;  %v244_v20 = vmul.f32 1.1111112, %v242_v4  ;;  %vm501_vm14 = vcmp.gt.s32.totalorder %v224_v2, 1677721  ;;  %vm326_vm11 = vcmask 1040384  }
  0x42   :  { %vm505_vm15 = vcmp.gt.s32.totalorder %v225_v3, 1677721  ;;  %v245_v23 = vmul.f32 1.1111112, %v243_v9  ;;  %vm328_vm12 = vcmask 1042434   ;;  %vm330_vm13 = vcmask 1041408  }
  0x43   :  { %v248_v24 = vperm.slane %v244_v20, 0  ;;  %v249_v25 = vperm.slane %v244_v20, 1  ;;  %v250_v26 = vperm.slane %v244_v20, 2  ;;  %v251_v27 = vperm.slane %v244_v20, 3 }
  0x44   :  { %v252_v28 = vperm.slane %v244_v20, 4  ;;  %v253_v29 = vperm.slane %v244_v20, 5  ;;  %v254_v30 = vperm.slane %v244_v20, 6  ;;  %v255_v31 = vperm.slane %v244_v20, 7 }
  0x45   :  { %vm332_vm10 = vcmask 1044484   ;;  %v256_v32 = vperm.slane %v245_v23, 0  ;;  %v257_v33 = vperm.slane %v245_v23, 1  ;;  %v258_v34 = vperm.slane %v245_v23, 2 }
  0x46   :  { %v259_v35 = vperm.slane %v245_v23, 3  ;;  %v260_v36 = vperm.slane %v245_v23, 4  ;;  %v261_v37 = vperm.slane %v245_v23, 5  ;;  %v262_v38 = vperm.slane %v245_v23, 6 }
  0x47   :  { %v263_v39 = vperm.slane %v245_v23, 7  ;;  %v280_v40 = vsel %vm445_vm0, %v248_v24, 0.0  ;;  %v281_v41 = vsel %vm449_vm1, %v249_v25, 0.0  ;;  %v282_v42 = vsel %vm453_vm2, %v250_v26, 0.0 }
  0x48   :  { %v283_v43 = vsel %vm457_vm3, %v251_v27, 0.0  ;;  %v284_v44 = vsel %vm461_vm4, %v252_v28, 0.0  ;;  %v285_v45 = vsel %vm465_vm5, %v253_v29, 0.0  ;;  %v286_v46 = vsel %vm469_vm6, %v254_v30, 0.0 }
  0x49   :  { %v287_v47 = vsel %vm473_vm7, %v255_v31, 0.0  ;;  %v288_v48 = vsel %vm477_vm8, %v256_v32, 0.0  ;;  %v289_v49 = vsel %vm481_vm9, %v257_v33, 0.0  ;;  %vm587_vm0 = vnez %v576_v16 }
  0x4a   :  { %v290_v50 = vsel %vm587_vm0, %v258_v34, 0.0  ;;  %vm588_vm1 = vnez %v578_v17  ;;  %vm589_vm2 = vnez %v580_v18  ;;  %vm590_vm3 = vnez %v582_v19 }
  0x4b   :  { %v291_v51 = vsel %vm588_vm1, %v259_v35, 0.0  ;;  %v292_v52 = vsel %vm589_vm2, %v260_v36, 0.0  ;;  %v293_v53 = vsel %vm590_vm3, %v261_v37, 0.0  ;;  %v294_v54 = vsel %vm501_vm14, %v262_v38, 0.0 }
  0x4c   :  { %v295_v55 = vsel %vm505_vm15, %v263_v39, 0.0  ;;  %v312_v56 = vrot.slane %v281_v41, 7  ;;  %v313_v57 = vrot.slane %v282_v42, 6  ;;  %v314_v58 = vrot.slane %v283_v43, 5 }
  0x4d   :  { %v315_v59 = vrot.slane %v284_v44, 4  ;;  %v316_v60 = vrot.slane %v285_v45, 3  ;;  %v317_v61 = vrot.slane %v286_v46, 2  ;;  %v318_v62 = vrot.slane %v287_v47, 1 }
  0x4e   :  { %v319_v63 = vrot.slane %v289_v49, 7  ;;  %v320_v0 = vrot.slane %v290_v50, 6  ;;  %v321_v1 = vrot.slane %v291_v51, 5  ;;  %v322_v2 = vrot.slane %v292_v52, 4 }
  0x4f   :  { %v323_v3 = vrot.slane %v293_v53, 3  ;;  %v324_v4 = vrot.slane %v294_v54, 2  ;;  %v325_v5 = vrot.slane %v295_v55, 1  ;;  %v327_v7 = vsel %vm326_vm11, %v280_v40, %v312_v56 }
  0x50   :  { %v329_v8 = vsel %vm328_vm12, %v313_v57, %v314_v58  ;;  %v333_v10 = vsel %vm332_vm10, %v315_v59, %v316_v60  ;;  %vm334_vm4 = vcmask 1046534   ;;  %vm336_vm5 = vcmask 1045508  }
  0x51   :  { %v331_v9 = vsel %vm330_vm13, %v327_v7, %v329_v8  ;;  %v335_v11 = vsel %vm334_vm4, %v317_v61, %v318_v62  ;;  %vm338_vm6 = vcmask 1043456   ;;  %v340_v6 = vsel %vm326_vm11, %v288_v48, %v319_v63 }
  0x52   :  { %v341_v12 = vsel %vm328_vm12, %v320_v0, %v321_v1  ;;  %v337_v13 = vsel %vm336_vm5, %v333_v10, %v335_v11  ;;  %v343_v15 = vsel %vm332_vm10, %v322_v2, %v323_v3  ;;  %v344_v16 = vsel %vm334_vm4, %v324_v4, %v325_v5 }
  0x53   :  { %v342_v14 = vsel %vm330_vm13, %v340_v6, %v341_v12  ;;  %v339_v17 = vsel %vm338_vm6, %v331_v9, %v337_v13  ;;  %v345_v18 = vsel %vm336_vm5, %v343_v15, %v344_v16 }
  0x54   :  { %v346_v19 = vsel %vm338_vm6, %v342_v14, %v345_v18  ;;  %349 = vst [vmem:[#allocation7] sm:$0xff] %v339_v17 }
  0x55   :  { %350 = vst [vmem:[#allocation7 + $0x8] sm:$0xff] %v346_v19 }
  0x56   :  { %361 = dma.vmem_to_hbm [thread:$0]  %s357_s1, 256, %s359_s19, [#allocation6]  }
  0x57   :  { %420 = dma.done.wait [#allocation6], 256  }
  0x58   :  { %421 = vsyncadd [#allocation6], 4294967040 }
  0x59   :  { %366 = vsyncpa [#allocation5], 1 }
  0x5a   :  { %367 = vsyncpa [#allocation6], 1 }

</bundles_post_ra>
